<compile_context>
chip_gen: v7x
topology: tpu7x:2x2x1
jax: 0.10.0
libtpu: 0.0.40
codegen_flags: <defaults>
</compile_context>

<pallas_src>
import functools
import math

import jax
import jax.numpy as jnp
from jax import lax
from jax.experimental import pallas as pl
from jax.experimental.pallas import tpu as pltpu

PAD_ID = 0


def get_positional_embeddings(length, depth):
    # Pure-JAX parameter setup (mirrors the PyTorch helper).
    channels = jnp.arange(depth // 2, dtype=jnp.float32)[None, :]        # (1, depth//2)
    positions = jnp.arange(length, dtype=jnp.float32)[:, None]           # (length, 1)
    scaled = positions / jnp.power(10000.0, 2.0 * channels / depth)      # (length, depth//2)
    return jnp.concatenate([jnp.sin(scaled), jnp.cos(scaled)], axis=1)   # (length, depth)


def _pick_seq_tile(S, D, max_tile=512, per_tile_budget_bytes=24 * 1024 * 1024):
    """Largest divisor of S that is a multiple of 8 and fits a modest per-tile VMEM budget."""
    # Per-tile VMEM ~ (2x pos + 2x out + 1x scratch) * TS * D * 4 bytes.
    cap = min(max_tile, max(8, per_tile_budget_bytes // (20 * D)))
    best = 0
    for t in range(8, min(S, cap) + 1, 8):
        if S % t == 0:
            best = t
    return best if best else S   # fallback: full sequence (block == full dim is always legal)


def _maybe_split_for_two_cores(B, S, ts):
    """Keep >= 2 programs on the parallel axes so v7x's two TensorCores both get work."""
    if B * (S // ts) >= 2:
        return ts
    half = ts // 2
    if half >= 8 and half % 8 == 0 and S % half == 0:
        return half
    return ts


def _embedding_kernel(emb_scale, seq_len, tile_s,
                      ids_ref, word_ref, pos_ref, out_ref, gathered_ref):
    # ids_ref:      (B*S,) int32 in SMEM (scalar prefetch, flattened to avoid 2-D padding)
    # word_ref:     (V, D) word table, VMEM-resident (constant block index -> fetched once)
    # pos_ref:      (TS, D) positional tile for this sequence tile
    # out_ref:      (1, TS, D) output tile
    # gathered_ref: (TS, D) f32 VMEM scratch holding the gathered word rows
    b = pl.program_id(0)
    t = pl.program_id(1)
    base = b * seq_len + t * tile_s

    def gather_row(i, carry):
        tok = ids_ref[base + i]                                   # scalar read from SMEM
        gathered_ref[pl.ds(i, 1), :] = (
            word_ref[pl.ds(tok, 1), :].astype(jnp.float32))       # native-dtype row, upcast here
        return carry

    lax.fori_loop(0, tile_s, gather_row, 0, unroll=(tile_s <= 32))

    # Dense fused scale + positional add over the whole (TS, D) tile; single lane-dense store.
    out_ref[0] = (gathered_ref[...] * jnp.float32(emb_scale)
                  + pos_ref[...].astype(jnp.float32)).astype(out_ref.dtype)
    # TODO(synk): training-mode dropout not implemented (eval-mode dropout == identity).
    #             When added, fuse pltpu.prng_seed((seed, b, t)) + pltpu.prng_random_bits here.


def transformer_embedding(input_ids, start, word_embeddings, position_embeddings,
                          out_dtype=None):
    """input_ids: [B, S] int; start: python int / scalar. Returns [B, S, D]."""
    B, S = input_ids.shape
    V, D = word_embeddings.shape
    L, D2 = position_embeddings.shape
    assert D2 == D
    assert D % 128 == 0, "hidden dim must be lane-aligned (multiple of 128)"
    if isinstance(start, int):
        assert 0 <= start and start + S <= L, "positional window out of range"

    if out_dtype is None:
        # Match the PyTorch module: result dtype of (word * scale + pos).
        out_dtype = jnp.promote_types(word_embeddings.dtype, position_embeddings.dtype)
    out_dtype = jnp.dtype(out_dtype)

    emb_scale = math.sqrt(D)

    tile_s = _pick_seq_tile(S, D)
    tile_s = _maybe_split_for_two_cores(B, S, tile_s)
    num_tiles = S // tile_s

    # Guard against out-of-range token ids (would otherwise index outside the table).
    # NOTE: semantic difference vs. PyTorch (which would error on bad ids).
    ids = jnp.clip(input_ids.astype(jnp.int32), 0, V - 1).reshape(-1)   # 1-D -> no SMEM 2-D padding

    # Positional window [start:start+S]; kernel fetches (TS, D) sub-blocks per step.
    pos_win = lax.dynamic_slice(position_embeddings, (start, 0), (S, D))

    # VMEM footprint (word table is constant-index: fetched once; 2 buffers are still
    # allocated by the default pipeliner — acceptable for small/medium vocab tables).
    word_bytes = 2 * V * D * word_embeddings.dtype.itemsize
    pos_bytes = 2 * tile_s * D * pos_win.dtype.itemsize
    out_bytes = 2 * tile_s * D * out_dtype.itemsize
    scratch_bytes = tile_s * D * 4
    vmem_needed = word_bytes + pos_bytes + out_bytes + scratch_bytes + ids.size * 4
    assert vmem_needed < 60 * 1024 * 1024, (
        "word table too large for the VMEM-resident path; use the HBM row-gather path")
    vmem_limit = int(min(100 * 1024 * 1024,
                         max(8 * 1024 * 1024, int(1.5 * vmem_needed))))

    grid_spec = pltpu.PrefetchScalarGridSpec(
        num_scalar_prefetch=1,                    # flattened token ids -> SMEM
        grid=(B, num_tiles),
        in_specs=[
            # Word table: constant block index -> DMA'd into VMEM once, resident across grid.
            pl.BlockSpec((V, D), lambda b, t, ids_sref: (0, 0)),
            # Positional tile for this sequence tile only (keeps v7x VMEM footprint small).
            pl.BlockSpec((tile_s, D), lambda b, t, ids_sref: (t, 0)),
        ],
        out_specs=pl.BlockSpec((1, tile_s, D), lambda b, t, ids_sref: (b, t, 0)),
        scratch_shapes=[pltpu.VMEM((tile_s, D), jnp.float32)],
    )

    return pl.pallas_call(
        functools.partial(_embedding_kernel, emb_scale, S, tile_s),
        out_shape=jax.ShapeDtypeStruct((B, S, D), out_dtype),
        grid_spec=grid_spec,
        compiler_params=pltpu.CompilerParams(
            dimension_semantics=("parallel", "parallel"),
            vmem_limit_bytes=vmem_limit,
        ),
    )(ids, word_embeddings, pos_win)


if __name__ == "__main__":
    # Small config consistent with the module's __init__ / forward.
    dim_model = 128
    vocab_size = 64
    max_length = 48
    B, S = 2, 16
    start, end = 4, 20          # end - start == S
    assert end - start == S

    key = jax.random.PRNGKey(0)
    k_w, k_ids = jax.random.split(key)

    # Deterministic "init_method": normal(0, 0.02); padding_idx row zeroed,
    # matching torch.nn.Embedding(..., padding_idx=PAD_ID).
    word_embeddings = 0.02 * jax.random.normal(k_w, (vocab_size, dim_model), dtype=jnp.float32)
    word_embeddings = word_embeddings.at[PAD_ID].set(0.0)

    position_embeddings = get_positional_embeddings(max_length, dim_model)

    input_ids = jax.random.randint(k_ids, (B, S), 0, vocab_size, dtype=jnp.int32)

    out = transformer_embedding(input_ids, start, word_embeddings, position_embeddings)
    out = jax.block_until_ready(out)

    # Pure-JAX reference (eval-mode dropout == identity).
    ref = (word_embeddings[input_ids] * math.sqrt(dim_model)
           + position_embeddings[start:end][None, :, :])
    assert out.shape == (B, S, dim_model)
    assert out.dtype == jnp.float32
    assert jnp.allclose(out, ref, atol=1e-5, rtol=1e-5)

    print("KERNEL_OK")
</pallas_src>

<mosaic_0001>
module attributes {stable_mosaic.version = 11 : i64} {
  func.func @_embedding_kernel(%arg0: i32, %arg1: i32, %arg2: memref<32xi32, #tpu.memory_space<smem>>, %arg3: memref<64x128xf32, #tpu.memory_space<vmem>>, %arg4: memref<16x128xf32, #tpu.memory_space<vmem>>, %arg5: memref<1x16x128xf32, #tpu.memory_space<vmem>>, %arg6: memref<16x128xf32, #tpu.memory_space<vmem>>) attributes {dimension_semantics = [#tpu.dimension_semantics<parallel>, #tpu.dimension_semantics<parallel>], iteration_bounds = array<i64: 2, 1>, scalar_prefetch = 1 : i64, scratch_operands = 1 : i64, tpu.core_type = #tpu.core_type<tc>, window_params = [{pipeline_mode = #tpu.pipeline_mode<synchronous>, transform_indices = @transform_0, window_bounds = array<i64: 64, 128>}, {transform_indices = @transform_1, window_bounds = array<i64: 16, 128>}, {transform_indices = @transform_2, window_bounds = array<i64: 1, 16, 128>}]} {
    %c16_i32 = arith.constant 16 : i32
    %0 = arith.muli %arg0, %c16_i32 : i32
    %c16_i32_0 = arith.constant 16 : i32
    %1 = arith.muli %arg1, %c16_i32_0 : i32
    %2 = arith.addi %0, %1 : i32
    %c0_i32 = arith.constant 0 : i32
    %3 = arith.addi %2, %c0_i32 : i32
    %4 = arith.index_cast %3 : i32 to index
    %5 = memref.load %arg2[%4] : memref<32xi32, #tpu.memory_space<smem>>
    %6 = arith.index_cast %5 : i32 to index
    %c0 = arith.constant 0 : index
    %7 = vector.load %arg3[%6, %c0] : memref<64x128xf32, #tpu.memory_space<vmem>>, vector<1x128xf32>
    %8 = arith.index_cast %c0_i32 : i32 to index
    %c0_1 = arith.constant 0 : index
    %9 = vector.load %arg6[%8, %c0_1] : memref<16x128xf32, #tpu.memory_space<vmem>>, vector<1x128xf32>
    tpu.vector_store %arg6[%8, %c0_1], %7 {strides = array<i32>} : memref<16x128xf32, #tpu.memory_space<vmem>>, vector<1x128xf32>,
    %c1_i32 = arith.constant 1 : i32
    %10 = arith.addi %2, %c1_i32 : i32
    %11 = arith.index_cast %10 : i32 to index
    %12 = memref.load %arg2[%11] : memref<32xi32, #tpu.memory_space<smem>>
    %13 = arith.index_cast %12 : i32 to index
    %c0_2 = arith.constant 0 : index
    %14 = vector.load %arg3[%13, %c0_2] : memref<64x128xf32, #tpu.memory_space<vmem>>, vector<1x128xf32>
    %15 = arith.index_cast %c1_i32 : i32 to index
    %c0_3 = arith.constant 0 : index
    %16 = vector.load %arg6[%15, %c0_3] : memref<16x128xf32, #tpu.memory_space<vmem>>, vector<1x128xf32>
    tpu.vector_store %arg6[%15, %c0_3], %14 {strides = array<i32>} : memref<16x128xf32, #tpu.memory_space<vmem>>, vector<1x128xf32>,
    %c2_i32 = arith.constant 2 : i32
    %17 = arith.addi %2, %c2_i32 : i32
    %18 = arith.index_cast %17 : i32 to index
    %19 = memref.load %arg2[%18] : memref<32xi32, #tpu.memory_space<smem>>
    %20 = arith.index_cast %19 : i32 to index
    %c0_4 = arith.constant 0 : index
    %21 = vector.load %arg3[%20, %c0_4] : memref<64x128xf32, #tpu.memory_space<vmem>>, vector<1x128xf32>
    %22 = arith.index_cast %c2_i32 : i32 to index
    %c0_5 = arith.constant 0 : index
    %23 = vector.load %arg6[%22, %c0_5] : memref<16x128xf32, #tpu.memory_space<vmem>>, vector<1x128xf32>
    tpu.vector_store %arg6[%22, %c0_5], %21 {strides = array<i32>} : memref<16x128xf32, #tpu.memory_space<vmem>>, vector<1x128xf32>,
    %c3_i32 = arith.constant 3 : i32
    %24 = arith.addi %2, %c3_i32 : i32
    %25 = arith.index_cast %24 : i32 to index
    %26 = memref.load %arg2[%25] : memref<32xi32, #tpu.memory_space<smem>>
    %27 = arith.index_cast %26 : i32 to index
    %c0_6 = arith.constant 0 : index
    %28 = vector.load %arg3[%27, %c0_6] : memref<64x128xf32, #tpu.memory_space<vmem>>, vector<1x128xf32>
    %29 = arith.index_cast %c3_i32 : i32 to index
    %c0_7 = arith.constant 0 : index
    %30 = vector.load %arg6[%29, %c0_7] : memref<16x128xf32, #tpu.memory_space<vmem>>, vector<1x128xf32>
    tpu.vector_store %arg6[%29, %c0_7], %28 {strides = array<i32>} : memref<16x128xf32, #tpu.memory_space<vmem>>, vector<1x128xf32>,
    %c4_i32 = arith.constant 4 : i32
    %31 = arith.addi %2, %c4_i32 : i32
    %32 = arith.index_cast %31 : i32 to index
    %33 = memref.load %arg2[%32] : memref<32xi32, #tpu.memory_space<smem>>
    %34 = arith.index_cast %33 : i32 to index
    %c0_8 = arith.constant 0 : index
    %35 = vector.load %arg3[%34, %c0_8] : memref<64x128xf32, #tpu.memory_space<vmem>>, vector<1x128xf32>
    %36 = arith.index_cast %c4_i32 : i32 to index
    %c0_9 = arith.constant 0 : index
    %37 = vector.load %arg6[%36, %c0_9] : memref<16x128xf32, #tpu.memory_space<vmem>>, vector<1x128xf32>
    tpu.vector_store %arg6[%36, %c0_9], %35 {strides = array<i32>} : memref<16x128xf32, #tpu.memory_space<vmem>>, vector<1x128xf32>,
    %c5_i32 = arith.constant 5 : i32
    %38 = arith.addi %2, %c5_i32 : i32
    %39 = arith.index_cast %38 : i32 to index
    %40 = memref.load %arg2[%39] : memref<32xi32, #tpu.memory_space<smem>>
    %41 = arith.index_cast %40 : i32 to index
    %c0_10 = arith.constant 0 : index
    %42 = vector.load %arg3[%41, %c0_10] : memref<64x128xf32, #tpu.memory_space<vmem>>, vector<1x128xf32>
    %43 = arith.index_cast %c5_i32 : i32 to index
    %c0_11 = arith.constant 0 : index
    %44 = vector.load %arg6[%43, %c0_11] : memref<16x128xf32, #tpu.memory_space<vmem>>, vector<1x128xf32>
    tpu.vector_store %arg6[%43, %c0_11], %42 {strides = array<i32>} : memref<16x128xf32, #tpu.memory_space<vmem>>, vector<1x128xf32>,
    %c6_i32 = arith.constant 6 : i32
    %45 = arith.addi %2, %c6_i32 : i32
    %46 = arith.index_cast %45 : i32 to index
    %47 = memref.load %arg2[%46] : memref<32xi32, #tpu.memory_space<smem>>
    %48 = arith.index_cast %47 : i32 to index
    %c0_12 = arith.constant 0 : index
    %49 = vector.load %arg3[%48, %c0_12] : memref<64x128xf32, #tpu.memory_space<vmem>>, vector<1x128xf32>
    %50 = arith.index_cast %c6_i32 : i32 to index
    %c0_13 = arith.constant 0 : index
    %51 = vector.load %arg6[%50, %c0_13] : memref<16x128xf32, #tpu.memory_space<vmem>>, vector<1x128xf32>
    tpu.vector_store %arg6[%50, %c0_13], %49 {strides = array<i32>} : memref<16x128xf32, #tpu.memory_space<vmem>>, vector<1x128xf32>,
    %c7_i32 = arith.constant 7 : i32
    %52 = arith.addi %2, %c7_i32 : i32
    %53 = arith.index_cast %52 : i32 to index
    %54 = memref.load %arg2[%53] : memref<32xi32, #tpu.memory_space<smem>>
    %55 = arith.index_cast %54 : i32 to index
    %c0_14 = arith.constant 0 : index
    %56 = vector.load %arg3[%55, %c0_14] : memref<64x128xf32, #tpu.memory_space<vmem>>, vector<1x128xf32>
    %57 = arith.index_cast %c7_i32 : i32 to index
    %c0_15 = arith.constant 0 : index
    %58 = vector.load %arg6[%57, %c0_15] : memref<16x128xf32, #tpu.memory_space<vmem>>, vector<1x128xf32>
    tpu.vector_store %arg6[%57, %c0_15], %56 {strides = array<i32>} : memref<16x128xf32, #tpu.memory_space<vmem>>, vector<1x128xf32>,
    %c8_i32 = arith.constant 8 : i32
    %59 = arith.addi %2, %c8_i32 : i32
    %60 = arith.index_cast %59 : i32 to index
    %61 = memref.load %arg2[%60] : memref<32xi32, #tpu.memory_space<smem>>
    %62 = arith.index_cast %61 : i32 to index
    %c0_16 = arith.constant 0 : index
    %63 = vector.load %arg3[%62, %c0_16] : memref<64x128xf32, #tpu.memory_space<vmem>>, vector<1x128xf32>
    %64 = arith.index_cast %c8_i32 : i32 to index
    %c0_17 = arith.constant 0 : index
    %65 = vector.load %arg6[%64, %c0_17] : memref<16x128xf32, #tpu.memory_space<vmem>>, vector<1x128xf32>
    tpu.vector_store %arg6[%64, %c0_17], %63 {strides = array<i32>} : memref<16x128xf32, #tpu.memory_space<vmem>>, vector<1x128xf32>,
    %c9_i32 = arith.constant 9 : i32
    %66 = arith.addi %2, %c9_i32 : i32
    %67 = arith.index_cast %66 : i32 to index
    %68 = memref.load %arg2[%67] : memref<32xi32, #tpu.memory_space<smem>>
    %69 = arith.index_cast %68 : i32 to index
    %c0_18 = arith.constant 0 : index
    %70 = vector.load %arg3[%69, %c0_18] : memref<64x128xf32, #tpu.memory_space<vmem>>, vector<1x128xf32>
    %71 = arith.index_cast %c9_i32 : i32 to index
    %c0_19 = arith.constant 0 : index
    %72 = vector.load %arg6[%71, %c0_19] : memref<16x128xf32, #tpu.memory_space<vmem>>, vector<1x128xf32>
    tpu.vector_store %arg6[%71, %c0_19], %70 {strides = array<i32>} : memref<16x128xf32, #tpu.memory_space<vmem>>, vector<1x128xf32>,
    %c10_i32 = arith.constant 10 : i32
    %73 = arith.addi %2, %c10_i32 : i32
    %74 = arith.index_cast %73 : i32 to index
    %75 = memref.load %arg2[%74] : memref<32xi32, #tpu.memory_space<smem>>
    %76 = arith.index_cast %75 : i32 to index
    %c0_20 = arith.constant 0 : index
    %77 = vector.load %arg3[%76, %c0_20] : memref<64x128xf32, #tpu.memory_space<vmem>>, vector<1x128xf32>
    %78 = arith.index_cast %c10_i32 : i32 to index
    %c0_21 = arith.constant 0 : index
    %79 = vector.load %arg6[%78, %c0_21] : memref<16x128xf32, #tpu.memory_space<vmem>>, vector<1x128xf32>
    tpu.vector_store %arg6[%78, %c0_21], %77 {strides = array<i32>} : memref<16x128xf32, #tpu.memory_space<vmem>>, vector<1x128xf32>,
    %c11_i32 = arith.constant 11 : i32
    %80 = arith.addi %2, %c11_i32 : i32
    %81 = arith.index_cast %80 : i32 to index
    %82 = memref.load %arg2[%81] : memref<32xi32, #tpu.memory_space<smem>>
    %83 = arith.index_cast %82 : i32 to index
    %c0_22 = arith.constant 0 : index
    %84 = vector.load %arg3[%83, %c0_22] : memref<64x128xf32, #tpu.memory_space<vmem>>, vector<1x128xf32>
    %85 = arith.index_cast %c11_i32 : i32 to index
    %c0_23 = arith.constant 0 : index
    %86 = vector.load %arg6[%85, %c0_23] : memref<16x128xf32, #tpu.memory_space<vmem>>, vector<1x128xf32>
    tpu.vector_store %arg6[%85, %c0_23], %84 {strides = array<i32>} : memref<16x128xf32, #tpu.memory_space<vmem>>, vector<1x128xf32>,
    %c12_i32 = arith.constant 12 : i32
    %87 = arith.addi %2, %c12_i32 : i32
    %88 = arith.index_cast %87 : i32 to index
    %89 = memref.load %arg2[%88] : memref<32xi32, #tpu.memory_space<smem>>
    %90 = arith.index_cast %89 : i32 to index
    %c0_24 = arith.constant 0 : index
    %91 = vector.load %arg3[%90, %c0_24] : memref<64x128xf32, #tpu.memory_space<vmem>>, vector<1x128xf32>
    %92 = arith.index_cast %c12_i32 : i32 to index
    %c0_25 = arith.constant 0 : index
    %93 = vector.load %arg6[%92, %c0_25] : memref<16x128xf32, #tpu.memory_space<vmem>>, vector<1x128xf32>
    tpu.vector_store %arg6[%92, %c0_25], %91 {strides = array<i32>} : memref<16x128xf32, #tpu.memory_space<vmem>>, vector<1x128xf32>,
    %c13_i32 = arith.constant 13 : i32
    %94 = arith.addi %2, %c13_i32 : i32
    %95 = arith.index_cast %94 : i32 to index
    %96 = memref.load %arg2[%95] : memref<32xi32, #tpu.memory_space<smem>>
    %97 = arith.index_cast %96 : i32 to index
    %c0_26 = arith.constant 0 : index
    %98 = vector.load %arg3[%97, %c0_26] : memref<64x128xf32, #tpu.memory_space<vmem>>, vector<1x128xf32>
    %99 = arith.index_cast %c13_i32 : i32 to index
    %c0_27 = arith.constant 0 : index
    %100 = vector.load %arg6[%99, %c0_27] : memref<16x128xf32, #tpu.memory_space<vmem>>, vector<1x128xf32>
    tpu.vector_store %arg6[%99, %c0_27], %98 {strides = array<i32>} : memref<16x128xf32, #tpu.memory_space<vmem>>, vector<1x128xf32>,
    %c14_i32 = arith.constant 14 : i32
    %101 = arith.addi %2, %c14_i32 : i32
    %102 = arith.index_cast %101 : i32 to index
    %103 = memref.load %arg2[%102] : memref<32xi32, #tpu.memory_space<smem>>
    %104 = arith.index_cast %103 : i32 to index
    %c0_28 = arith.constant 0 : index
    %105 = vector.load %arg3[%104, %c0_28] : memref<64x128xf32, #tpu.memory_space<vmem>>, vector<1x128xf32>
    %106 = arith.index_cast %c14_i32 : i32 to index
    %c0_29 = arith.constant 0 : index
    %107 = vector.load %arg6[%106, %c0_29] : memref<16x128xf32, #tpu.memory_space<vmem>>, vector<1x128xf32>
    tpu.vector_store %arg6[%106, %c0_29], %105 {strides = array<i32>} : memref<16x128xf32, #tpu.memory_space<vmem>>, vector<1x128xf32>,
    %c15_i32 = arith.constant 15 : i32
    %108 = arith.addi %2, %c15_i32 : i32
    %109 = arith.index_cast %108 : i32 to index
    %110 = memref.load %arg2[%109] : memref<32xi32, #tpu.memory_space<smem>>
    %111 = arith.index_cast %110 : i32 to index
    %c0_30 = arith.constant 0 : index
    %112 = vector.load %arg3[%111, %c0_30] : memref<64x128xf32, #tpu.memory_space<vmem>>, vector<1x128xf32>
    %113 = arith.index_cast %c15_i32 : i32 to index
    %c0_31 = arith.constant 0 : index
    %114 = vector.load %arg6[%113, %c0_31] : memref<16x128xf32, #tpu.memory_space<vmem>>, vector<1x128xf32>
    tpu.vector_store %arg6[%113, %c0_31], %112 {strides = array<i32>} : memref<16x128xf32, #tpu.memory_space<vmem>>, vector<1x128xf32>,
    %c16_i32_32 = arith.constant 16 : i32
    %c0_33 = arith.constant 0 : index
    %c0_34 = arith.constant 0 : index
    %115 = vector.load %arg6[%c0_33, %c0_34] : memref<16x128xf32, #tpu.memory_space<vmem>>, vector<16x128xf32>
    %cst = arith.constant 11.3137083 : f32
    %116 = vector.broadcast %cst : f32 to vector<16x128xf32>
    %117 = arith.mulf %115, %116 : vector<16x128xf32>
    %c0_35 = arith.constant 0 : index
    %c0_36 = arith.constant 0 : index
    %118 = vector.load %arg4[%c0_35, %c0_36] : memref<16x128xf32, #tpu.memory_space<vmem>>, vector<16x128xf32>
    %119 = arith.addf %117, %118 : vector<16x128xf32>
    %c0_37 = arith.constant 0 : index
    %c0_38 = arith.constant 0 : index
    %c0_39 = arith.constant 0 : index
    %120 = vector.load %arg5[%c0_37, %c0_38, %c0_39] : memref<1x16x128xf32, #tpu.memory_space<vmem>>, vector<1x16x128xf32>
    %121 = vector.shape_cast %120 : vector<1x16x128xf32> to vector<16x128xf32>
    %122 = vector.shape_cast %119 : vector<16x128xf32> to vector<1x16x128xf32>
    tpu.vector_store %arg5[%c0_37, %c0_38, %c0_39], %122 {strides = array<i32>} : memref<1x16x128xf32, #tpu.memory_space<vmem>>, vector<1x16x128xf32>,
    return
  }
  func.func @transform_0(%arg0: i32, %arg1: i32, %arg2: memref<32xi32, #tpu.memory_space<smem>>) -> (i32, i32) {
    %c0_i32 = arith.constant 0 : i32
    %c0_i32_0 = arith.constant 0 : i32
    %c0_i32_1 = arith.constant 0 : i32
    return %c0_i32, %c0_i32_0 : i32, i32
  }
  func.func @transform_1(%arg0: i32, %arg1: i32, %arg2: memref<32xi32, #tpu.memory_space<smem>>) -> (i32, i32) {
    %c0_i32 = arith.constant 0 : i32
    %c0_i32_0 = arith.constant 0 : i32
    return %arg1, %c0_i32 : i32, i32
  }
  func.func @transform_2(%arg0: i32, %arg1: i32, %arg2: memref<32xi32, #tpu.memory_space<smem>>) -> (i32, i32, i32) {
    %c0_i32 = arith.constant 0 : i32
    %c0_i32_0 = arith.constant 0 : i32
    return %arg0, %arg1, %c0_i32 : i32, i32, i32
  }
}

</mosaic_0001>

<bundles_post_ra>
// kernel: tpu_custom_call.1
= control target key start
LH: loop header
LB: loop body
LE: loop exit
PB: predicated region body
PF: predicated region fallthrough
CT: control target
= control target key end

     0   :  { %s891_s0 = inlined_call_operand.hbm [shape: s32[32], index: 0, kind: input, shape index: {}]   ;;  %s892_s1 = inlined_call_operand.hbm [shape: f32[64,128], index: 1, kind: input, shape index: {}]   ;;  %s893_s2 = inlined_call_operand.hbm [shape: f32[16,128], index: 2, kind: input, shape index: {}]   ;;  %s894_s3 = inlined_call_operand.hbm [shape: f32[2,16,128], index: 3, kind: output, shape index: {}]  }
   0x1   :  { %899 = sst [smem:[#allocation15_spill]] %s892_s1  ;;  %s487_s14 = scalar_lea.hbm %s891_s0, 16 }
   0x2   :  { %p488_p0 = scmp.ne.s32.totalorder %s891_s0, %s487_s14  ;;  %p491_p1 = scmp.lt.u32.totalorder %s487_s14, %s891_s0 }
   0x4   :  { %p493_p2 = pnand %p491_p1, %p488_p0 }
   0x6   :  { %496 = shalt.err (!%p493_p2)  }
   0x7   :  { %s643_s19 = smov [#allocation4]  }
   0x8   :  { %9 = dma.hbm_to_smem %s891_s0, 16, %s643_s19, [#allocation3] }
   0x9   :  { %605 = dma.done.wait [#allocation3], 16 }
   0xa   :  { %606 = vsyncadd [#allocation3], 4294967280 }
   0xb   :  { %11 = sfence }
   0xc   :  { %12 = vsyncpa [#allocation6], 0 }
   0xd   :  { %13 = vsyncpa [#allocation9], 0 }
   0xe   :  { %14 = vsyncpa [#allocation7], 0 }
   0xf   :  { %16 = vsyncpa [#allocation7 + $0x1], 0  ;;  %s683_s22 = smov 0   ;;  %s685_s23 = smov 0  }
  0x10   :  { %s687_s24 = smov 0   ;;  %s689_s25 = smov 0  }
  0x11   :  { %s691_s26 = smov 0   ;;  %s693_s27 = smov 0  }
  0x12 LB: > { %s390_s0 = sadd.s32 4294967295, %s641_s27   ;;  %s391_s28 = sadd.s32 4294967294, %s641_s27   ;;  %s641_s27 = sphi %s693_s27, %s22_s27   ;;  %s637_s26 = sphi %s691_s26, %s916_s26   ;;  %s633_s25 = sphi %s689_s25, %s915_s25   ;;  %s629_s24 = sphi %s687_s24, %s914_s24   ;;  %s625_s23 = sphi %s685_s23, %s913_s23   ;;  %s621_s22 = sphi %s683_s22, %s912_s22  }
  0x13   : > { %s34_s29 = sadd.s32 1, %s637_s26  ;;  %s90_s30 = sadd.s32 1, %s629_s24 }
  0x14   : > { %p36_p3 = scmp.ge.s32.totalorder %s34_s29, 2  ;;  %p100_p4 = scmp.ne.s32.totalorder %s629_s24, %s625_s23 }
  0x15   : > { %p101_p5 = scmp.eq.s32.totalorder %s390_s0, 1  ;;  %p106_p6 = scmp.ne.s32.totalorder %s625_s23, %s621_s22 }
  0x16   : > { %s918_s29 = smov (%p36_p3, %s34_s29), 0  ;;  %p107_p8 = scmp.eq.s32.totalorder %s391_s28, 1 }
  0x17   : > { %p723_p7 = por %p101_p5, %p100_p4  ;;  %s85_s5 = ssub.s32 %s637_s26, %s918_s29 }
  0x18   : > { %p392_p9 = scmp.ge.s32.totalorder %s641_s27, 1  ;;  %p88_p10 = scmp.eq.s32.totalorder %s85_s5, 0 }
  0x19   : > { %s900_s4 = scalar_select %p723_p7, 1, 0 }
  0x1a   : > { %p730_p11 = por %p107_p8, %p106_p6  ;;  %p114_p12 = scmp.lt.s32.totalorder %s641_s27, 3 }
  0x1b   : > { %s736_s7 = scalar_select %p88_p10, %s629_s24, %s90_s30  }
  0x1c   : > { %s901_s6 = scalar_select %p730_p11, 1, 0 }
  0x1d   : > { %p738_p13 = pnand %p392_p9, %p114_p12  ;;  %p742_p0 = scmp.eq.s32.totalorder %s390_s0, 0 }
  0x1e   : > { %s644_s10 = smov [#allocation5]   ;;  %s645_s13 = smov [#allocation8]  }
  0x1f   : > { %s902_s8 = scalar_select %p738_p13, 1, 0 }
  0x20   : > { %s903_s9 = scalar_select %p742_p0, 1, 0 }
  0x21   : > { %p416_p1 = pneg %p738_p13  ;;  %s126_s11 = sshll.u32 %s644_s10, 4  ;;  %s127_s11 = int_to_ptr.vmem [resolvable:$true] %s126_s11 }
  0x22   : > { %s142_s14 = sshll.u32 %s645_s13, 4  ;;  %s905_s1 = sld [smem:[#allocation15_spill]]  ;;  %s754_s14 = int_to_ptr.vmem [resolvable:$true] %s142_s14 }
  0x23   : > { %p750_p2 = pnand %p742_p0, %p416_p1 }
  0x25   : > { %p499_p4 = pneg %p750_p2 }
  0x28   : > { %s497_s17 = scalar_lea.hbm %s905_s1, 1024 }
  0x29   : > { %p498_p3 = scmp.ne.s32.totalorder %s905_s1, %s497_s17  ;;  %p504_p8 = scmp.lt.u32.totalorder %s497_s17, %s905_s1 }
  0x2b   : > { %p500_p5 = pnand %p499_p4, %p498_p3 }
  0x2d   : > { %p501_p6 = pneg %p500_p5 }
  0x2f   : > { %p506_p9 = pnand %p504_p8, %p501_p6 }
  0x31   : > { %509 = shalt.err (!%p506_p9)
}
  0x32   : > { %s510_s0 = scalar_lea.vmem %s127_s11, 1024  ;;  %p518_p11 = scmp.lt.s32.totalorder %s127_s11, %s127_s11 }
  0x33   : > { %p511_p10 = scmp.ne.s32.totalorder %s127_s11, %s510_s0  ;;  %p519_p7 = scmp.lt.s32.totalorder %s510_s0, %s510_s0 }
  0x35   : > { %p513_p12 = pnand %p511_p10, %p499_p4  ;;  %p520_p0 = por %p519_p7, %p518_p11 }
  0x37   : > { %p514_p1 = pneg %p513_p12 }
  0x39   : > { %p521_p13 = pnand %p520_p0, %p514_p1 }
  0x3b   : > { %524 = shalt.err (!%p521_p13)
}
  0x3c   : > { %s646_s28 = smov 128   ;;  %s647_s30 = smov 8  }
  0x3d   : > { %419 = dma.hbm_to_vmem [thread:$0]  (!%p750_p2), %s905_s1, 1024, %s127_s11, [#allocation6], %s646_s28, %s646_s28, %s647_s30  }
  0x3e   : > { %s525_s16 = scalar_lea.hbm %s893_s2, 256 }
  0x3f   : > { %p526_p3 = scmp.ne.s32.totalorder %s893_s2, %s525_s16  ;;  %p532_p13 = scmp.lt.u32.totalorder %s525_s16, %s893_s2 }
  0x41   : > { %p528_p7 = pnand %p526_p3, %p499_p4 }
  0x43   : > { %p529_p11 = pneg %p528_p7 }
  0x45   : > { %p534_p0 = pnand %p532_p13, %p529_p11 }
  0x47   : > { %537 = shalt.err (!%p534_p0)
}
  0x48   : > { %s538_s11 = scalar_lea.vmem %s754_s14, 256  ;;  %p546_p9 = scmp.lt.s32.totalorder %s754_s14, %s754_s14 }
  0x49   : > { %p539_p5 = scmp.ne.s32.totalorder %s754_s14, %s538_s11  ;;  %p547_p10 = scmp.lt.s32.totalorder %s538_s11, %s538_s11 }
  0x4b   : > { %p541_p6 = pnand %p539_p5, %p499_p4  ;;  %p548_p12 = por %p547_p10, %p546_p9 }
  0x4d   : > { %p542_p8 = pneg %p541_p6 }
  0x4f   : > { %p549_p1 = pnand %p548_p12, %p542_p8 }
  0x51   : > { %552 = shalt.err (!%p549_p1)
}
  0x52   : > { %422 = dma.hbm_to_vmem [thread:$0]  (!%p750_p2), %s893_s2, 256, %s754_s14, [#allocation9], %s646_s28, %s646_s28, %s647_s30  }
  0x53   : > { %p906_p3 = scmp.ne.s32.totalorder %s902_s8, 0 }
  0x54   : > { %p907_p7 = scmp.ne.s32.totalorder (!%p906_p3), %s903_s9, 0 }
  0x55   : > { %158 = sbr.rel (%p906_p3) target bundleno = 151 (0x97), region = 28 }
  0x5c   : > { %608 = dma.done.wait (%p907_p7), [#allocation6], 1024  }
  0x5d   : > { %610 = vsyncadd (%p907_p7), [#allocation6], 4294966272 }
  0x5e   : > { %612 = dma.done.wait (%p907_p7), [#allocation9], 256  }
  0x5f   : > { %614 = vsyncadd (%p907_p7), [#allocation9], 4294967040  ;;  %s814_s12 = sshll.u32 %s633_s25, 4  ;;  %v267_v14 = vld [vmem:[#allocation8] sm:$0xff]  ;;  %v268_v21 = vld [vmem:[#allocation8 + $0x8] sm:$0xff]  ;;  %p910_p4 = scmp.ne.s32.totalorder %s900_s4, 0 }
  0x60   : > { %s184_s14 = sld [smem:[#allocation4 + %s814_s12]]  ;;  %s188_s28 = sadd.s32 1, %s814_s12 }
  0x61   : > { %s189_s30 = sld [smem:[#allocation4 + %s188_s28]]  ;;  %s193_s5 = sadd.s32 2, %s814_s12 }
  0x62   : > { %s194_s10 = sld [smem:[#allocation4 + %s193_s5]]  ;;  %s198_s9 = sadd.s32 3, %s814_s12 }
  0x63   : > { %s199_s13 = sld [smem:[#allocation4 + %s198_s9]]  ;;  %s203_s15 = sadd.s32 4, %s814_s12 }
  0x64   : > { %s204_s16 = sld [smem:[#allocation4 + %s203_s15]]  ;;  %s208_s17 = sadd.s32 5, %s814_s12 }
  0x65   : > { %s209_s18 = sld [smem:[#allocation4 + %s208_s17]]  ;;  %s213_s19 = sadd.s32 6, %s814_s12 }
  0x66   : > { %s214_s20 = sld [smem:[#allocation4 + %s213_s19]]  ;;  %s185_s11 = scalar_lea.vmem [#allocation5], %s184_s14 }
  0x67   : > { %v186_v0 = vld [vmem:[%s185_s11] sm:$0x1]  ;;  %s218_s21 = sadd.s32 7, %s814_s12  ;;  %s190_s0 = scalar_lea.vmem [#allocation5], %s189_s30 }
  0x68   : > { %187 = vst [vmem:[#allocation2] sm:$0x1] %v186_v0  ;;  %v191_v1 = vld [vmem:[%s190_s0] sm:$0x1]  ;;  %s219_s8 = sld [smem:[#allocation4 + %s218_s21]]  ;;  %s195_s28 = scalar_lea.vmem [#allocation5], %s194_s10 }
  0x69   : > { %192 = vst [vmem:[#allocation2 + $0x1] sm:$0x1] %v191_v1  ;;  %v196_v2 = vld [vmem:[%s195_s28] sm:$0x1]  ;;  %s223_s5 = sadd.s32 8, %s814_s12  ;;  %s200_s9 = scalar_lea.vmem [#allocation5], %s199_s13 }
  0x6a   : > { %197 = vst [vmem:[#allocation2 + $0x2] sm:$0x1] %v196_v2  ;;  %v201_v3 = vld [vmem:[%s200_s9] sm:$0x1]  ;;  %s224_s15 = sld [smem:[#allocation4 + %s223_s5]]  ;;  %s205_s17 = scalar_lea.vmem [#allocation5], %s204_s16 }
  0x6b   : > { %202 = vst [vmem:[#allocation2 + $0x3] sm:$0x1] %v201_v3  ;;  %v206_v4 = vld [vmem:[%s205_s17] sm:$0x1]  ;;  %s228_s14 = sadd.s32 9, %s814_s12  ;;  %s210_s19 = scalar_lea.vmem [#allocation5], %s209_s18 }
  0x6c   : > { %207 = vst [vmem:[#allocation2 + $0x4] sm:$0x1] %v206_v4  ;;  %v211_v5 = vld [vmem:[%s210_s19] sm:$0x1]  ;;  %s229_s30 = sld [smem:[#allocation4 + %s228_s14]]  ;;  %s215_s10 = scalar_lea.vmem [#allocation5], %s214_s20 }
  0x6d   : > { %212 = vst [vmem:[#allocation2 + $0x5] sm:$0x1] %v211_v5  ;;  %v216_v6 = vld [vmem:[%s215_s10] sm:$0x1]  ;;  %s233_s11 = sadd.s32 10, %s814_s12  ;;  %s238_s21 = sadd.s32 11, %s814_s12 }
  0x6e   : > { %217 = vst [vmem:[#allocation2 + $0x6] sm:$0x1] %v216_v6  ;;  %s234_s13 = sld [smem:[#allocation4 + %s233_s11]]  ;;  %s220_s0 = scalar_lea.vmem [#allocation5], %s219_s8 }
  0x6f   : > { %v221_v7 = vld [vmem:[%s220_s0] sm:$0x1]  ;;  %s239_s16 = sld [smem:[#allocation4 + %s238_s21]]  ;;  %s243_s28 = sadd.s32 12, %s814_s12 }
  0x70   : > { %222 = vst [vmem:[#allocation2 + $0x7] sm:$0x1] %v221_v7  ;;  %s244_s5 = sld [smem:[#allocation4 + %s243_s28]]  ;;  %s225_s9 = scalar_lea.vmem [#allocation5], %s224_s15 }
  0x71   : > { %v226_v8 = vld [vmem:[%s225_s9] sm:$0x1]  ;;  %s248_s18 = sadd.s32 13, %s814_s12  ;;  %s253_s17 = sadd.s32 14, %s814_s12 }
  0x72   : > { %227 = vst [vmem:[#allocation2 + $0x8] sm:$0x1] %v226_v8  ;;  %s249_s14 = sld [smem:[#allocation4 + %s248_s18]]  ;;  %s230_s20 = scalar_lea.vmem [#allocation5], %s229_s30 }
  0x73   : > { %v231_v9 = vld [vmem:[%s230_s20] sm:$0x1]  ;;  %s254_s19 = sld [smem:[#allocation4 + %s253_s17]]  ;;  %s258_s10 = sadd.s32 15, %s814_s12 }
  0x74   : > { %232 = vst [vmem:[#allocation2 + $0x9] sm:$0x1] %v231_v9  ;;  %s259_s11 = sld [smem:[#allocation4 + %s258_s10]]  ;;  %s235_s1 = scalar_lea.vmem [#allocation5], %s234_s13 }
  0x75   : > { %v236_v10 = vld [vmem:[%s235_s1] sm:$0x1]  ;;  %s240_s8 = scalar_lea.vmem [#allocation5], %s239_s16  ;;  %s908_s21 = sand.u32 1, %s625_s23  }
  0x76   : > { %237 = vst [vmem:[#allocation2 + $0xa] sm:$0x1] %v236_v10  ;;  %v241_v11 = vld [vmem:[%s240_s8] sm:$0x1]  ;;  %s398_s0 = sshll.u32 %s908_s21, 4  ;;  %s245_s15 = scalar_lea.vmem [#allocation5], %s244_s5 }
  0x77   : > { %242 = vst [vmem:[#allocation2 + $0xb] sm:$0x1] %v241_v11  ;;  %v246_v12 = vld [vmem:[%s245_s15] sm:$0x1]  ;;  %s178_s13 = scalar_lea.vmem [#allocation10], %s398_s0  ;;  %s405_s28 = sshll.u32 %s633_s25, 8 }
  0x78   : > { %v263_v13 = vld [vmem:[#allocation2] sm:$0xff]  ;;  %247 = vst [vmem:[#allocation2 + $0xc] sm:$0x1] %v246_v12  ;;  %s250_s30 = scalar_lea.vmem [#allocation5], %s249_s14  ;;  %s289_s16 = sshll.u32 %s178_s13, 4  ;;  %s836_s16 = int_to_ptr.vmem [resolvable:$true] %s289_s16 }
  0x79   : > { %v265_v15 = vmul.f32 11.313708, %v263_v13  ;;  %v251_v16 = vld [vmem:[%s250_s30] sm:$0x1]  ;;  %s255_s12 = scalar_lea.vmem [#allocation5], %s254_s19  ;;  %s841_s18 = scalar_lea.hbm %s894_s3, %s405_s28 }
  0x7a   : > { %252 = vst [vmem:[#allocation2 + $0xd] sm:$0x1] %v251_v16  ;;  %v256_v17 = vld [vmem:[%s255_s12] sm:$0x1]  ;;  %s260_s1 = scalar_lea.vmem [#allocation5], %s259_s11  ;;  %s909_s17 = smov %s908_s21 }
  0x7b   : > { %v269_v18 = vadd.f32 %v267_v14, %v265_v15  ;;  %257 = vst [vmem:[#allocation2 + $0xe] sm:$0x1] %v256_v17  ;;  %v261_v19 = vld [vmem:[%s260_s1] sm:$0x1]  ;;  %s845_s14 = scalar_lea.sflag [#allocation7], %s909_s17  ;;  %s553_s20 = scalar_lea.vmem %s836_s16, 256 }
  0x7c   : > { %262 = vst [vmem:[#allocation2 + $0xf] sm:$0x1] %v261_v19  ;;  %p554_p2 = scmp.ne.s32.totalorder %s836_s16, %s553_s20  ;;  %s648_s25 = smov [#allocation10]  }
  0x7d   : > { %271 = vst [vmem:[%s178_s13] sm:$0xff] %v269_v18  ;;  %s557_s19 = sshll.u32 %s648_s25, 4  ;;  %s558_s19 = int_to_ptr.vmem [resolvable:$false] %s557_s19 }
  0x7e   : > { %p555_p11 = pnand %p554_p2, %p910_p4  ;;  %s559_s10 = scalar_lea.vmem %s558_s19, 512 }
  0x7f   : > { %p560_p0 = scmp.lt.s32.totalorder %s836_s16, %s558_s19  ;;  %p561_p5 = scmp.lt.s32.totalorder %s559_s10, %s553_s20 }
  0x80   : > { %p556_p13 = pneg %p555_p11 }
  0x81   : > { %p562_p6 = por %p561_p5, %p560_p0 }
  0x83   : > { %v264_v20 = vld [vmem:[#allocation2 + $0x8] sm:$0xff]  ;;  %p563_p8 = pnand %p562_p6, %p556_p13 }
  0x84   : > { %v266_v22 = vmul.f32 11.313708, %v264_v20 }
  0x86   : > { %v270_v23 = vadd.f32 %v268_v21, %v266_v22 }
  0x88   : > { %272 = vst [vmem:[%s178_s13 + $0x8] sm:$0xff] %v270_v23 }
  0x89   : > { %566 = shalt.err (!%p563_p8)
}
  0x8a   : > { %s567_s11 = scalar_lea.hbm %s841_s18, 256  ;;  %s571_s0 = scalar_lea.hbm %s894_s3, 512 }
  0x8b   : > { %p568_p9 = scmp.ne.s32.totalorder %s841_s18, %s567_s11  ;;  %p572_p1 = scmp.lt.u32.totalorder %s841_s18, %s894_s3 }
  0x8c   : > { %p573_p3 = scmp.lt.u32.totalorder %s571_s0, %s567_s11  ;;  %p575_p2 = scmp.lt.u32.totalorder %s567_s11, %s841_s18 }
  0x8d   : > { %p569_p10 = pnand %p568_p9, %p910_p4 }
  0x8e   : > { %p574_p7 = por %p573_p3, %p572_p1 }
  0x8f   : > { %p570_p12 = pneg %p569_p10 }
  0x90   : > { %p576_p11 = por %p575_p2, %p574_p7 }
  0x92   : > { %p577_p13 = pnand %p576_p11, %p570_p12 }
  0x94   : > { %580 = shalt.err (!%p577_p13)
}
  0x95   : > { %s649_s12 = smov 128   ;;  %s650_s1 = smov 8  }
  0x96   : > { %414 = dma.vmem_to_hbm [thread:$0]  (%p910_p4), %s836_s16, 256, %s841_s18, %s845_s14, %s649_s12, %s649_s12, %s650_s1  }
  0x97 PF: > { %p431_p0 = scmp.ge.s32.totalorder %s641_s27, 2  ;;  %s304_s13 = sand.u32 1, %s621_s22  }
  0x98   : > { %p911_p5 = scmp.ne.s32.totalorder %s901_s6, 0  ;;  %s305_s28 = scalar_lea.sflag [#allocation7], %s304_s13 }
  0x9a   : > { %p424_p6 = pnand %p431_p0, %p911_p5 }
  0x9c   : > { %616 = dma.done.wait (!%p424_p6), %s305_s28, 256  }
  0x9d   : > { %618 = vsyncadd (!%p424_p6), %s305_s28, 4294967040  ;;  %s22_s27 = sadd.s32 1, %s641_s27   ;;  %s912_s22 = smov %s625_s23 }
  0x9e   : > { %p19_p8 = scmp.ge.s32.totalorder %s22_s27, 4   ;;  %s913_s23 = smov %s629_s24 }
  0x9f   : > { %s914_s24 = smov %s736_s7  ;;  %s915_s25 = smov %s637_s26 }
  0xa0   : > { %s916_s26 = smov %s918_s29  ;;  %21 = sbr.rel (!%p19_p8) target bundleno = 18 (0x12), region = 86 }
  0xa7   :  { %310 = vsyncpa [#allocation6], 1 }
  0xa8   :  { %312 = vsyncpa [#allocation6 + $0x1], 1 }
  0xa9   :  { %313 = vsyncpa [#allocation9], 1 }
  0xaa   :  { %314 = vsyncpa [#allocation7], 1 }
  0xab   :  { %316 = vsyncpa [#allocation7 + $0x1], 1 }

</bundles_post_ra>
